<compile_context>
chip_gen: v7x
topology: tpu7x:2x2x1
jax: 0.10.0
libtpu: 0.0.40
codegen_flags: <defaults>
</compile_context>

<pallas_src>
import functools
import math

import jax
import jax.numpy as jnp
from jax.experimental import pallas as pl
from jax.experimental.pallas import tpu as pltpu


def make_positional_encoding(max_len, d_model, dtype=jnp.float32):
    """Exactly the buffer PyTorch's __init__ builds (requires even d_model)."""
    position = jnp.arange(max_len, dtype=jnp.float32)[:, None]               # [L, 1]
    div_term = jnp.exp(jnp.arange(0, d_model, 2, dtype=jnp.float32)
                       * (-math.log(10000.0) / d_model))                     # [D/2]
    angles = position * div_term                                             # [L, D/2]
    pe = jnp.zeros((max_len, d_model), jnp.float32)
    pe = pe.at[:, 0::2].set(jnp.sin(angles))
    pe = pe.at[:, 1::2].set(jnp.cos(angles))
    return pe.astype(dtype)


def _pos_enc_kernel(x_ref, pe_ref, o_ref):
    # x_ref / o_ref: (B, tile_s, D) tiles; pe_ref: (tile_s, D), broadcast over batch.
    # pe is already in the activation dtype (cast once in the wrapper).
    o_ref[...] = x_ref[...] + pe_ref[...][None, :, :]


@functools.partial(jax.jit, static_argnames=("block_bytes", "donate_x"))
def positional_encoding_forward(x, pe, *, block_bytes=2 * 1024 * 1024,
                                donate_x=False):
    """x: [B, S, D]; pe: [max_len, D] (max_len >= S) -> [B, S, D] (eval-mode forward)."""
    B, S, D = x.shape
    max_len, d_model = pe.shape
    if d_model != D or max_len < S:
        raise ValueError("pe table does not cover the input")

    itemsize = jnp.dtype(x.dtype).itemsize
    sublane = max(8, 32 // itemsize)          # 8 f32 / 16 bf16 / 32 int8-fp8 packing

    # Lane-dense layout: if d_model is not a multiple of 128, fold it into the
    # row dim so the minor dim of every tile is a full 128 lanes wide.
    fold = (D % 128 != 0) and ((S * D) % 128 == 0)
    if fold:
        S_k, D_k = (S * D) // 128, 128
        x_k = x.reshape(B, S_k, D_k)                        # free (contiguous reshape)
        pe_k = pe[:S].astype(x.dtype).reshape(S_k, D_k)     # tiny slice; fold requires it
    else:
        S_k, D_k = S, D
        x_k = x
        # Pass the full table when possible (avoids an extra S*D HBM slice op
        # in front of the kernel); only slice when a dtype cast is needed anyway.
        pe_k = pe if pe.dtype == x.dtype else pe[:S].astype(x.dtype)

    # ~block_bytes of x per grid step, rounded to the dtype's sublane packing.
    row_bytes = B * D_k * itemsize
    tile_s = max(sublane, (block_bytes // row_bytes) // sublane * sublane)
    if tile_s >= S_k:
        tile_s = S_k                                        # full extent is always legal
    n_s = pl.cdiv(S_k, tile_s)

    out = pl.pallas_call(
        _pos_enc_kernel,
        out_shape=jax.ShapeDtypeStruct((B, S_k, D_k), x.dtype),
        grid=(n_s,),
        in_specs=[
            pl.BlockSpec((B, tile_s, D_k), lambda s: (0, s, 0)),   # x: batch in block
            pl.BlockSpec((tile_s, D_k), lambda s: (s, 0)),          # pe: read once/tile
        ],
        out_specs=pl.BlockSpec((B, tile_s, D_k), lambda s: (0, s, 0)),
        input_output_aliases={0: 0} if donate_x else {},
        compiler_params=pltpu.CompilerParams(
            dimension_semantics=("parallel",)),                     # megacore shards seq
    )(x_k, pe_k)

    # TODO(synk): training-mode nn.Dropout(p=0.1) would be fused in-kernel
    # (pltpu.prng_seed + pltpu.prng_random_bits mask/scale before the store)
    # instead of a second HBM pass; eval-mode dropout is the identity.
    return out.reshape(B, S, D) if fold else out


if __name__ == "__main__":
    key = jax.random.PRNGKey(0)
    k1, k2, k3 = jax.random.split(key, 3)
    MAX_LEN = 5000

    # Case 1: module-sized shapes (batch=2, seq=8, d_model=32) -> folded lane-dense path.
    B, S, D = 2, 8, 32
    x = jax.random.normal(k1, (B, S, D), dtype=jnp.float32)
    pe = make_positional_encoding(MAX_LEN, D)
    out = jax.block_until_ready(positional_encoding_forward(x, pe))
    ref = x + pe[None, :S, :]
    assert out.shape == (B, S, D)
    assert jnp.allclose(out, ref, atol=1e-6, rtol=1e-6), "mismatch (folded path)"

    # Case 2: d_model multiple of 128 -> unfolded path, full pe table passed (no slice).
    B2, S2, D2 = 2, 384, 128
    x2 = jax.random.normal(k2, (B2, S2, D2), dtype=jnp.float32)
    pe2 = make_positional_encoding(MAX_LEN, D2)
    out2 = jax.block_until_ready(positional_encoding_forward(x2, pe2))
    ref2 = x2 + pe2[None, :S2, :]
    assert jnp.allclose(out2, ref2, atol=1e-6, rtol=1e-6), "mismatch (unfolded path)"

    # Case 3: bf16 activations (wrapper-side pe cast), non-tile-aligned seq so the
    # last grid step is an edge tile, and output aliased onto x (donate_x).
    B3, S3, D3 = 2, 200, 128
    x3 = jax.random.normal(k3, (B3, S3, D3), dtype=jnp.bfloat16)
    ref3 = x3 + pe2[:S3].astype(jnp.bfloat16)[None, :, :]
    out3 = jax.block_until_ready(
        positional_encoding_forward(x3, pe2, block_bytes=64 * 1024, donate_x=True))
    assert jnp.allclose(out3.astype(jnp.float32), ref3.astype(jnp.float32),
                        atol=1e-2, rtol=1e-2), "mismatch (bf16 edge-tile path)"

    print("KERNEL_OK")
</pallas_src>

<mosaic_0001>
module attributes {stable_mosaic.version = 11 : i64} {
  func.func @_pos_enc_kernel(%arg0: i32, %arg1: memref<2x2x128xf32, #tpu.memory_space<vmem>>, %arg2: memref<2x128xf32, #tpu.memory_space<vmem>>, %arg3: memref<2x2x128xf32, #tpu.memory_space<vmem>>) attributes {dimension_semantics = [#tpu.dimension_semantics<parallel>], iteration_bounds = array<i64: 1>, scalar_prefetch = 0 : i64, scratch_operands = 0 : i64, tpu.core_type = #tpu.core_type<tc>, window_params = [{transform_indices = @transform_0, window_bounds = array<i64: 2, 2, 128>}, {transform_indices = @transform_1, window_bounds = array<i64: 2, 128>}, {transform_indices = @transform_2, window_bounds = array<i64: 2, 2, 128>}]} {
    %c0 = arith.constant 0 : index
    %c0_0 = arith.constant 0 : index
    %c0_1 = arith.constant 0 : index
    %0 = vector.load %arg1[%c0, %c0_0, %c0_1] : memref<2x2x128xf32, #tpu.memory_space<vmem>>, vector<2x2x128xf32>
    %c0_2 = arith.constant 0 : index
    %c0_3 = arith.constant 0 : index
    %1 = vector.load %arg2[%c0_2, %c0_3] : memref<2x128xf32, #tpu.memory_space<vmem>>, vector<2x128xf32>
    %2 = vector.shape_cast %1 : vector<2x128xf32> to vector<1x2x128xf32>
    %3 = vector.broadcast %2 : vector<1x2x128xf32> to vector<2x2x128xf32>
    %4 = arith.addf %0, %3 : vector<2x2x128xf32>
    %c0_4 = arith.constant 0 : index
    %c0_5 = arith.constant 0 : index
    %c0_6 = arith.constant 0 : index
    %5 = vector.load %arg3[%c0_4, %c0_5, %c0_6] : memref<2x2x128xf32, #tpu.memory_space<vmem>>, vector<2x2x128xf32>
    tpu.vector_store %arg3[%c0_4, %c0_5, %c0_6], %4 {strides = array<i32>} : memref<2x2x128xf32, #tpu.memory_space<vmem>>, vector<2x2x128xf32>,
    return
  }
  func.func @transform_0(%arg0: i32) -> (i32, i32, i32) {
    %c0_i32 = arith.constant 0 : i32
    %c0_i32_0 = arith.constant 0 : i32
    %c0_i32_1 = arith.constant 0 : i32
    return %c0_i32, %arg0, %c0_i32_0 : i32, i32, i32
  }
  func.func @transform_1(%arg0: i32) -> (i32, i32) {
    %c0_i32 = arith.constant 0 : i32
    %c0_i32_0 = arith.constant 0 : i32
    return %arg0, %c0_i32 : i32, i32
  }
  func.func @transform_2(%arg0: i32) -> (i32, i32, i32) {
    %c0_i32 = arith.constant 0 : i32
    %c0_i32_0 = arith.constant 0 : i32
    %c0_i32_1 = arith.constant 0 : i32
    return %c0_i32, %arg0, %c0_i32_0 : i32, i32, i32
  }
}

</mosaic_0001>

<bundles_post_ra>
// kernel: positional_encoding_forward.1
= control target key start
LH: loop header
LB: loop body
LE: loop exit
PB: predicated region body
PF: predicated region fallthrough
CT: control target
= control target key end

     0   :  { %s52_s0 = inlined_call_operand.vmem [shape: f32[2,2,128], index: 0, kind: input, shape index: {}]   ;;  %s53_s1 = inlined_call_operand.vmem [shape: f32[2,128], index: 1, kind: input, shape index: {}]   ;;  %s54_s2 = inlined_call_operand.vmem [shape: f32[2,2,128], index: 2, kind: output, shape index: {}]  }
   0x1   :  { %v11_v0 = vld [vmem:[%s52_s0] sm:$0x3]  ;;  %v12_v2 = vld [vmem:[%s52_s0 + $0x2] sm:$0x3] }
   0x2   :  { %v13_v1 = vld [vmem:[%s53_s1] sm:$0x3] }
   0x3   :  { %v14_v3 = vadd.f32 %v13_v1, %v11_v0  ;;  %v15_v4 = vadd.f32 %v13_v1, %v12_v2 }
   0x5   :  { %16 = vst [vmem:[%s54_s2] sm:$0x3] %v14_v3  ;;  %17 = vst [vmem:[%s54_s2 + $0x2] sm:$0x3] %v15_v4 }

</bundles_post_ra>
